<compile_context>
chip_gen: v7x
topology: tpu7x:2x2x1
jax: 0.10.0
libtpu: 0.0.40
codegen_flags: <defaults>
</compile_context>

<pallas_src>
import jax
import jax.numpy as jnp
from jax.experimental import pallas as pl
from jax.experimental.pallas import tpu as pltpu


_VPU_MAX_C = 4  # channel counts above this use the MXU for the 1x1 conv


def _resblock_kernel(a_ref, w_ref, x_ref, o_ref):
    """One (1, C, TS) tile:  out = PReLU(w_eff @ x), with w_eff = conv3_w + I.

    a_ref: (1, 1) PReLU slope in SMEM (single shared slope).
    w_ref: (C, C) residual-folded 1x1-conv weight, resident in VMEM.
    x_ref: (1, C, TS) input tile (channels on sublanes, spatial on lanes).
    o_ref: (1, C, TS) output tile.
    """
    x = x_ref[0]
    C = x.shape[0]

    if C <= _VPU_MAX_C:
        # Tiny channel count: C broadcast FMAs on the VPU.  Compute in f32
        # (v5e has no bf16 VALU).  Residual is already folded into w, so we
        # start the accumulator from the ci == 0 term (no extra "+ x").
        xf = x.astype(jnp.float32)
        w = w_ref[...].astype(jnp.float32)
        acc = w[:, 0:1] * xf[0:1, :]
        for ci in range(1, C):  # static unroll (C is a trace-time constant)
            acc = acc + w[:, ci:ci + 1] * xf[ci:ci + 1, :]
    else:
        # Channel contraction on the MXU: native operand dtype (bf16-in /
        # f32-acc for bf16 inputs), residual already folded into the weight.
        acc = jnp.dot(w_ref[...], x, preferred_element_type=jnp.float32)

    a = a_ref[0, 0]
    y = jnp.where(acc > 0, acc, a * acc)  # PReLU, single shared slope
    o_ref[0] = y.astype(o_ref.dtype)


def _round_up(v, m):
    return ((v + m - 1) // m) * m


def _spatial_tiling(spatial, channels, dtype_bytes, n_batch,
                    max_tile_bytes=4 << 20):
    """Lane-dense spatial tiling.

    Returns (tile_size, n_tiles).  If the whole spatial extent fits in one
    ~max_tile_bytes buffer we use a single full-extent block (no masking, no
    OOB lanes).  Otherwise tiles are a multiple of 128 lanes and the ragged
    last block is masked by the Pallas pipeline.
    """
    lane = 128
    per_lane_bytes = channels * dtype_bytes
    max_ts = max(lane, (max_tile_bytes // per_lane_bytes) // lane * lane)

    if spatial <= max_ts:
        return spatial, 1  # single full-extent block

    ts = max_ts
    n_tiles = pl.cdiv(spatial, ts)
    # Best effort: keep the total number of grid steps even so v7x's two
    # TensorCores split the work evenly (wrapper-side only, no padding).
    if (n_batch * n_tiles) % 2 == 1:
        cand_ts = max(lane, _round_up(pl.cdiv(spatial, n_tiles + 1), lane))
        if pl.cdiv(spatial, cand_ts) == n_tiles + 1:
            ts, n_tiles = cand_ts, n_tiles + 1
    return ts, n_tiles


@jax.jit
def resblock_forward(x_nchw, w3, prelu_a):
    """x_nchw: (N, C, H, W); w3: (C, C, 1, 1) conv3 weight; prelu_a: scalar slope."""
    N, C, H, W = x_nchw.shape
    assert w3.shape == (C, C, 1, 1), "residual add requires inC == outC (1x1 conv, bias=False)"

    S = H * W
    dtype_bytes = jnp.dtype(x_nchw.dtype).itemsize
    ts, n_tiles = _spatial_tiling(S, C, dtype_bytes, N)

    # NCHW -> (N, C, H*W): contiguous reshape, no transpose / extra HBM pass.
    x3 = x_nchw.reshape(N, C, S)

    # Fold the residual into the 1x1 conv: w_eff = W + I (done once at trace
    # time) and keep the weight in the input dtype so bf16 inputs run the MXU
    # natively (bf16-in / f32-acc).
    w_eff = w3.reshape(C, C).astype(jnp.float32) + jnp.eye(C, dtype=jnp.float32)
    w_eff = w_eff.astype(x_nchw.dtype)
    a = jnp.reshape(prelu_a, (1, 1)).astype(jnp.float32)  # PReLU slope -> SMEM

    cost = pl.CostEstimate(
        flops=2 * N * C * C * S + 2 * N * C * S,
        transcendentals=0,
        bytes_accessed=2 * N * C * S * dtype_bytes + C * C * dtype_bytes,
    )

    out3 = pl.pallas_call(
        _resblock_kernel,
        out_shape=jax.ShapeDtypeStruct((N, C, S), x_nchw.dtype),
        grid_spec=pltpu.PrefetchScalarGridSpec(
            num_scalar_prefetch=0,
            grid=(N, n_tiles),
            in_specs=[
                pl.BlockSpec(memory_space=pltpu.SMEM),             # PReLU slope
                pl.BlockSpec((C, C), lambda n, s: (0, 0)),         # folded weight (resident)
                pl.BlockSpec((1, C, ts), lambda n, s: (n, 0, s)),  # x tile
            ],
            out_specs=pl.BlockSpec((1, C, ts), lambda n, s: (n, 0, s)),
        ),
        compiler_params=pltpu.CompilerParams(
            dimension_semantics=("parallel", "parallel"),
            vmem_limit_bytes=40 * 1024 * 1024,
        ),
        cost_estimate=cost,
    )(a, w_eff, x3)

    return out3.reshape(N, C, H, W)


def _reference(x_nchw, w3, prelu_a):
    """Pure-JAX reference of the PyTorch forward (output-equivalent)."""
    N, C, H, W = x_nchw.shape
    w = w3.reshape(C, C)
    y = jnp.einsum("oc,nchw->nohw", w, x_nchw) + x_nchw
    return jnp.where(y > 0, y, prelu_a * y)


if __name__ == "__main__":
    key = jax.random.PRNGKey(0)
    k_x, k_x2, k_x3, k_w1, k_w2, k_w3, k_w3b = jax.random.split(key, 7)

    # Case 1: C = 4 (VPU path), spatial a multiple of 128.
    N, C, H, W = 2, 4, 16, 16  # inChannels == outChannels == 4
    x = jax.random.normal(k_x, (N, C, H, W), dtype=jnp.float32)

    # Parameter shapes matching the nn.Conv2d weights.
    w1 = jax.random.normal(k_w1, (C, C, 1, 1), dtype=jnp.float32) * 0.1  # dead branch (unused)
    w2 = jax.random.normal(k_w2, (C, C, 3, 3), dtype=jnp.float32) * 0.1  # dead branch (unused)
    w3 = jax.random.normal(k_w3, (C, C, 1, 1), dtype=jnp.float32) * 0.1
    prelu_a = jnp.float32(0.25)  # nn.PReLU() default (single shared slope)

    out = jax.block_until_ready(resblock_forward(x, w3, prelu_a))
    ref = _reference(x, w3, prelu_a)
    assert out.shape == (N, C, H, W)
    assert jnp.allclose(out, ref, atol=1e-5, rtol=1e-5)

    # Case 2: ragged spatial (H*W = 100, not a multiple of 128) — exercises
    # the no-pad / masked-lane path.
    x_odd = jax.random.normal(k_x2, (1, C, 10, 10), dtype=jnp.float32)
    out_odd = jax.block_until_ready(resblock_forward(x_odd, w3, prelu_a))
    assert out_odd.shape == (1, C, 10, 10)
    assert jnp.allclose(out_odd, _reference(x_odd, w3, prelu_a), atol=1e-5, rtol=1e-5)

    # Case 3: C = 16 (MXU path), ragged spatial.  Loose tolerance: the MXU may
    # evaluate the f32 contraction with bf16 passes at default precision.
    C2 = 16
    x_big = jax.random.normal(k_x3, (1, C2, 12, 12), dtype=jnp.float32)
    w3b = jax.random.normal(k_w3b, (C2, C2, 1, 1), dtype=jnp.float32) * 0.1
    out_big = jax.block_until_ready(resblock_forward(x_big, w3b, prelu_a))
    assert out_big.shape == (1, C2, 12, 12)
    assert jnp.allclose(out_big, _reference(x_big, w3b, prelu_a), atol=3e-2, rtol=3e-2)

    print("KERNEL_OK")
</pallas_src>

<mosaic_0001>
module attributes {stable_mosaic.version = 11 : i64} {
  func.func @_resblock_kernel(%arg0: i32, %arg1: i32, %arg2: memref<1x1xf32, #tpu.memory_space<smem>>, %arg3: memref<4x4xf32, #tpu.memory_space<vmem>>, %arg4: memref<1x4x256xf32, #tpu.memory_space<vmem>>, %arg5: memref<1x4x256xf32, #tpu.memory_space<vmem>>) attributes {dimension_semantics = [#tpu.dimension_semantics<parallel>, #tpu.dimension_semantics<parallel>], iteration_bounds = array<i64: 2, 1>, scalar_prefetch = 0 : i64, scratch_operands = 0 : i64, tpu.core_type = #tpu.core_type<tc>, window_params = [{transform_indices = @transform_0, window_bounds = array<i64: 1, 1>}, {pipeline_mode = #tpu.pipeline_mode<synchronous>, transform_indices = @transform_1, window_bounds = array<i64: 4, 4>}, {transform_indices = @transform_2, window_bounds = array<i64: 1, 4, 256>}, {transform_indices = @transform_3, window_bounds = array<i64: 1, 4, 256>}]} {
    %c0 = arith.constant 0 : index
    %c0_0 = arith.constant 0 : index
    %c0_1 = arith.constant 0 : index
    %0 = vector.load %arg4[%c0, %c0_0, %c0_1] : memref<1x4x256xf32, #tpu.memory_space<vmem>>, vector<1x4x256xf32>
    %1 = vector.shape_cast %0 : vector<1x4x256xf32> to vector<4x256xf32>
    %c0_2 = arith.constant 0 : index
    %c0_3 = arith.constant 0 : index
    %2 = vector.load %arg3[%c0_2, %c0_3] : memref<4x4xf32, #tpu.memory_space<vmem>>, vector<4x4xf32>
    %3 = vector.extract_strided_slice %2 {offsets = [0, 0], sizes = [4, 1], strides = [1, 1]} : vector<4x4xf32> to vector<4x1xf32>
    %4 = vector.extract_strided_slice %1 {offsets = [0, 0], sizes = [1, 256], strides = [1, 1]} : vector<4x256xf32> to vector<1x256xf32>
    %5 = vector.broadcast %3 : vector<4x1xf32> to vector<4x256xf32>
    %6 = vector.broadcast %4 : vector<1x256xf32> to vector<4x256xf32>
    %7 = arith.mulf %5, %6 : vector<4x256xf32>
    %8 = vector.extract_strided_slice %2 {offsets = [0, 1], sizes = [4, 1], strides = [1, 1]} : vector<4x4xf32> to vector<4x1xf32>
    %9 = vector.extract_strided_slice %1 {offsets = [1, 0], sizes = [1, 256], strides = [1, 1]} : vector<4x256xf32> to vector<1x256xf32>
    %10 = vector.broadcast %8 : vector<4x1xf32> to vector<4x256xf32>
    %11 = vector.broadcast %9 : vector<1x256xf32> to vector<4x256xf32>
    %12 = arith.mulf %10, %11 : vector<4x256xf32>
    %13 = arith.addf %7, %12 : vector<4x256xf32>
    %14 = vector.extract_strided_slice %2 {offsets = [0, 2], sizes = [4, 1], strides = [1, 1]} : vector<4x4xf32> to vector<4x1xf32>
    %15 = vector.extract_strided_slice %1 {offsets = [2, 0], sizes = [1, 256], strides = [1, 1]} : vector<4x256xf32> to vector<1x256xf32>
    %16 = vector.broadcast %14 : vector<4x1xf32> to vector<4x256xf32>
    %17 = vector.broadcast %15 : vector<1x256xf32> to vector<4x256xf32>
    %18 = arith.mulf %16, %17 : vector<4x256xf32>
    %19 = arith.addf %13, %18 : vector<4x256xf32>
    %20 = vector.extract_strided_slice %2 {offsets = [0, 3], sizes = [4, 1], strides = [1, 1]} : vector<4x4xf32> to vector<4x1xf32>
    %21 = vector.extract_strided_slice %1 {offsets = [3, 0], sizes = [1, 256], strides = [1, 1]} : vector<4x256xf32> to vector<1x256xf32>
    %22 = vector.broadcast %20 : vector<4x1xf32> to vector<4x256xf32>
    %23 = vector.broadcast %21 : vector<1x256xf32> to vector<4x256xf32>
    %24 = arith.mulf %22, %23 : vector<4x256xf32>
    %25 = arith.addf %19, %24 : vector<4x256xf32>
    %c0_4 = arith.constant 0 : index
    %c0_5 = arith.constant 0 : index
    %26 = memref.load %arg2[%c0_4, %c0_5] : memref<1x1xf32, #tpu.memory_space<smem>>
    %cst = arith.constant 0.000000e+00 : f32
    %27 = vector.broadcast %cst : f32 to vector<4x256xf32>
    %28 = arith.cmpf ogt, %25, %27 : vector<4x256xf32>
    %29 = vector.broadcast %26 : f32 to vector<4x256xf32>
    %30 = arith.mulf %29, %25 : vector<4x256xf32>
    %31 = arith.select %28, %25, %30 : vector<4x256xi1>, vector<4x256xf32>
    %c0_6 = arith.constant 0 : index
    %c0_7 = arith.constant 0 : index
    %c0_8 = arith.constant 0 : index
    %32 = vector.load %arg5[%c0_6, %c0_7, %c0_8] : memref<1x4x256xf32, #tpu.memory_space<vmem>>, vector<1x4x256xf32>
    %33 = vector.shape_cast %32 : vector<1x4x256xf32> to vector<4x256xf32>
    %34 = vector.shape_cast %31 : vector<4x256xf32> to vector<1x4x256xf32>
    tpu.vector_store %arg5[%c0_6, %c0_7, %c0_8], %34 {strides = array<i32>} : memref<1x4x256xf32, #tpu.memory_space<vmem>>, vector<1x4x256xf32>,
    return
  }
  func.func @transform_0(%arg0: i32, %arg1: i32) -> (i32, i32) {
    %c0_i32 = arith.constant 0 : i32
    %c0_i32_0 = arith.constant 0 : i32
    %c0_i32_1 = arith.constant 0 : i32
    return %c0_i32, %c0_i32_0 : i32, i32
  }
  func.func @transform_1(%arg0: i32, %arg1: i32) -> (i32, i32) {
    %c0_i32 = arith.constant 0 : i32
    %c0_i32_0 = arith.constant 0 : i32
    %c0_i32_1 = arith.constant 0 : i32
    return %c0_i32, %c0_i32_0 : i32, i32
  }
  func.func @transform_2(%arg0: i32, %arg1: i32) -> (i32, i32, i32) {
    %c0_i32 = arith.constant 0 : i32
    %c0_i32_0 = arith.constant 0 : i32
    return %arg0, %c0_i32, %arg1 : i32, i32, i32
  }
  func.func @transform_3(%arg0: i32, %arg1: i32) -> (i32, i32, i32) {
    %c0_i32 = arith.constant 0 : i32
    %c0_i32_0 = arith.constant 0 : i32
    return %arg0, %c0_i32, %arg1 : i32, i32, i32
  }
}

</mosaic_0001>

<bundles_post_ra>
// kernel: resblock_forward.1
= control target key start
LH: loop header
LB: loop body
LE: loop exit
PB: predicated region body
PF: predicated region fallthrough
CT: control target
= control target key end

     0   :  { %s514_s14 = smov 0   ;;  %s516_s15 = smov 0   ;;  %s557_s0 = inlined_call_operand.<no memory space> [shape: f32[1,1], index: 0, kind: input, shape index: {}]   ;;  %s558_s1 = inlined_call_operand.vmem [shape: f32[4,4], index: 1, kind: input, shape index: {}]   ;;  %s559_s2 = inlined_call_operand.vmem [shape: f32[2,4,256], index: 2, kind: input, shape index: {}]   ;;  %s560_s3 = inlined_call_operand.vmem [shape: f32[2,4,256], index: 3, kind: output, shape index: {}]  }
   0x1   :  { %8 = sst [smem:[#allocation2]] %s557_s0  ;;  %s518_s16 = smov 0  }
   0x2 LB: > { %s26_s0 = sadd.s32 1, %s481_s15  ;;  %p421_p0 = scmp.ge.s32.totalorder %s485_s16, 1  ;;  %s485_s16 = sphi %s518_s16, %s14_s16   ;;  %s481_s15 = sphi %s516_s15, %s562_s15   ;;  %s477_s14 = sphi %s514_s14, %s561_s14  }
   0x3   : > { %p28_p1 = scmp.ge.s32.totalorder %s26_s0, 2  ;;  %p159_p2 = scmp.lt.s32.totalorder %s485_s16, 3 }
   0x5   : > { %s564_s0 = smov (%p28_p1, %s26_s0), 0  ;;  %p160_p3 = pnand %p421_p0, %p159_p2 }
   0x6   : > { %v212_v0 = vld [vmem:[%s558_s1] sm:$0xf] (!%p160_p3)  ;;  %v487_v1 = vmov (!%p160_p3), 0   ;;  %v488_v2 = vmov (!%p160_p3), 2   ;;  %v489_v3 = vmov (!%p160_p3), 1   ;;  %v490_v4 = vmov (!%p160_p3), 3  }
   0x7   : > { %163 = sbr.rel (%p160_p3) target bundleno = 155 (0x9b), region = 32  ;;  %458 = vset.pattern.permute.xlu0 (!%p160_p3), %v487_v1  ;;  %460 = vset.pattern.permute.xlu1 (!%p160_p3), %v488_v2  ;;  %p192_p4 = scmp.lt.s32.totalorder (!%p160_p3), %s477_s14, 1  ;;  %v219_v5 = vlaneseq (!%p160_p3) }
   0x8   : > { %215 = vperm.xlu0 (!%p160_p3), %458, %v212_v0   ;;  %266 = vperm.xlu1 (!%p160_p3), %460, %v212_v0   ;;  %s317_s23 = sld [smem:[#allocation2]] (!%p160_p3) }
   0x9   : > { %v220_v6 = vshrl.u32 (!%p160_p3), %v219_v5, 7 }
   0xb   : > { %v221_v7 = vsub.s32 (!%p160_p3), 0, %v220_v6  ;;  %v225_v8 = vsub.s32 (!%p160_p3), 4, %v220_v6  ;;  %v245_v9 = vsub.s32 (!%p160_p3), 1, %v220_v6  ;;  %v249_v10 = vsub.s32 (!%p160_p3), 5, %v220_v6 }
   0xc   : > { %459 = vset.pattern.permute.xlu0 (!%p160_p3), %v489_v3  ;;  %461 = vset.pattern.permute.xlu1 (!%p160_p3), %v490_v4  ;;  %v271_v12 = vsub.s32 (!%p160_p3), 2, %v220_v6  ;;  %v275_v13 = vsub.s32 (!%p160_p3), 6, %v220_v6  ;;  %v297_v14 = vsub.s32 (!%p160_p3), 3, %v220_v6  ;;  %v301_v15 = vsub.s32 (!%p160_p3), 7, %v220_v6 }
   0xd   : > { %240 = vperm.xlu0 (!%p160_p3), %459, %v212_v0   ;;  %292 = vperm.xlu1 (!%p160_p3), %461, %v212_v0  }
   0xe   : > { %s566_s14 = smov (!%p192_p4, %s477_s14), 1  ;;  %v320_v48 = vstv %s317_s23 }
   0xf   : > { %s428_s19 = sshll.u32 %s566_s14, 3 }
  0x10   : > { %s199_s22 = scalar_lea.vmem %s559_s2, %s428_s19  ;;  %s209_s26 = scalar_lea.vmem %s560_s3, %s428_s19 }
  0x11   : > { %462 = vset.pattern.permute.xlu0 %v490_v4  ;;  %v211_v11 = vld [vmem:[%s199_s22] sm:$0xff] }
  0x12   : > { %v222_v16 = vrot.slane %v211_v11, %v221_v7  ;;  %v226_v17 = vrot.slane %v211_v11, %v225_v8  ;;  %v246_v18 = vrot.slane %v211_v11, %v245_v9  ;;  %v250_v19 = vrot.slane %v211_v11, %v249_v10 }
  0x13   : > { %v272_v20 = vrot.slane %v211_v11, %v271_v12  ;;  %v276_v21 = vrot.slane %v211_v11, %v275_v13  ;;  %v298_v24 = vrot.slane %v211_v11, %v297_v14  ;;  %v302_v25 = vrot.slane %v211_v11, %v301_v15 }
  0x14   : > { %v232_v26 = vrot.slane %v222_v16, %v221_v7  ;;  %v236_v27 = vrot.slane %v226_v17, %v221_v7  ;;  %v256_v28 = vrot.slane %v246_v18, %v245_v9  ;;  %v260_v29 = vrot.slane %v250_v19, %v245_v9 }
  0x15   : > { %v282_v30 = vrot.slane %v272_v20, %v271_v12  ;;  %v286_v31 = vrot.slane %v276_v21, %v271_v12  ;;  %v308_v32 = vrot.slane %v298_v24, %v297_v14  ;;  %v312_v33 = vrot.slane %v302_v25, %v297_v14 }
  0x87   : > { %v216_v22 = vpop.permute.xlu0 %215  ;;  %v267_v23 = vpop.permute.xlu1 %266 }
  0x88   : > { %v237_v36 = vmul.f32 %v232_v26, %v216_v22  ;;  %v238_v37 = vmul.f32 %v236_v27, %v216_v22  ;;  %v287_v40 = vmul.f32 %v282_v30, %v267_v23  ;;  %v288_v41 = vmul.f32 %v286_v31, %v267_v23 }
  0x8c   : > { %v241_v34 = vpop.permute.xlu0 %240  ;;  %v293_v35 = vpop.permute.xlu1 %292 }
  0x8d   : > { %v261_v38 = vmul.f32 %v256_v28, %v241_v34  ;;  %v262_v39 = vmul.f32 %v260_v29, %v241_v34  ;;  %v313_v44 = vmul.f32 %v308_v32, %v293_v35  ;;  %v314_v45 = vmul.f32 %v312_v33, %v293_v35 }
  0x8f   : > { %v263_v42 = vadd.f32 %v261_v38, %v237_v36  ;;  %v264_v43 = vadd.f32 %v262_v39, %v238_v37 }
  0x91   : > { %v289_v46 = vadd.f32 %v287_v40, %v263_v42  ;;  %v290_v47 = vadd.f32 %v288_v41, %v264_v43 }
  0x93   : > { %v315_v49 = vadd.f32 %v313_v44, %v289_v46  ;;  %v316_v50 = vadd.f32 %v314_v45, %v290_v47 }
  0x95   : > { %vm318_vm0 = vcmp.gt.f32.partialorder %v315_v49, 0.0  ;;  %vm319_vm1 = vcmp.gt.f32.partialorder %v316_v50, 0.0  ;;  %v321_v51 = vmul.f32 %v320_v48, %v315_v49  ;;  %v322_v52 = vmul.f32 %v320_v48, %v316_v50 }
  0x97   : > { %v323_v53 = vsel %vm318_vm0, %v315_v49, %v321_v51  ;;  %v324_v54 = vsel %vm319_vm1, %v316_v50, %v322_v52 }
  0x98   : > { %v327_v55 = vcombine.low %v323_v53, %v324_v54 }
  0x9a   : > { %329 = vst [vmem:[%s209_s26] sm:$0xff] %v327_v55 }
  0x9b PF: > { %s14_s16 = sadd.s32 1, %s485_s16   ;;  %s561_s14 = smov %s481_s15 }
  0x9c   : > { %p11_p5 = scmp.ge.s32.totalorder %s14_s16, 4   ;;  %s562_s15 = smov %s564_s0 }
  0x9e   :  { %13 = sbr.rel (!%p11_p5) target bundleno = 2 (0x2), region = 62 }

</bundles_post_ra>
